<compile_context>
chip_gen: v7x
topology: tpu7x:2x2x1
jax: 0.10.0
libtpu: 0.0.40
codegen_flags: <defaults>
</compile_context>

<pallas_src>
import numpy as np
import jax
import jax.numpy as jnp
from jax import lax
from jax.experimental import pallas as pl
from jax.experimental.pallas import tpu as pltpu  # noqa: F401  (kept for TPU-specific tuning hooks)

SELU_ALPHA = 1.6732632423543772
SELU_SCALE = 1.0507009873554805
BN_EPS = 1e-5


def _bilinear_matrix(out_size: int, in_size: int) -> np.ndarray:
    """Row-interpolation matrix for nn.Upsample(mode='bilinear', align_corners=True)."""
    M = np.zeros((out_size, in_size), dtype=np.float32)
    if out_size == 1:
        coords = np.zeros((1,), dtype=np.float64)
    else:
        coords = np.arange(out_size, dtype=np.float64) * (in_size - 1) / (out_size - 1)
    lo = np.clip(np.floor(coords).astype(np.int64), 0, in_size - 1)
    hi = np.minimum(lo + 1, in_size - 1)
    frac = (coords - lo).astype(np.float32)
    for i in range(out_size):
        M[i, lo[i]] += 1.0 - frac[i]
        M[i, hi[i]] += frac[i]
    return M


def _kernel(x_ref, at_ref, wmix_ref, pool_ref, gamma_ref, beta_ref, o_ref):
    # x_ref:    (N*Cin, S)        flattened input, rows ordered (batch, in_chan)
    # at_ref:   (S, Ppad)         bilinear upsample operator (transposed), lane = spatial
    # wmix_ref: (N*Cout, N*Cin)   block-diagonal (over batch) 1x1-conv weights,
    #                             rows ordered (batch, out_chan)
    # pool_ref: (N*Cout, N*Cout)  block-structured 1/(N*P): sums the N batch rows of
    #                             each channel and broadcasts the result back to rows
    # gamma/beta_ref: (N*Cout, 1) per-row (= per-channel) BN affine params
    # o_ref:    (N*Cout, Ppad)    lane-dense output

    # Upsample first (only N*Cin rows through the big S x Ppad operator),
    # then mix channels with the tiny block-diagonal weight.
    u = jnp.dot(x_ref[...], at_ref[...], preferred_element_type=jnp.float32)   # (N*Cin, Ppad)
    z = jnp.dot(wmix_ref[...], u, preferred_element_type=jnp.float32)          # (N*Cout, Ppad)

    # BatchNorm2d, training-mode batch statistics, single pass.
    # Lanes are reduced first (XLU), then a tiny (N*Cout x N*Cout x 1) matmul pools
    # over the batch. Padded lanes of z are exactly zero (At's padded columns are
    # zero), so summing all Ppad lanes with the 1/(N*P) factor baked into `pool`
    # yields the true per-channel moments.
    s1 = jnp.dot(pool_ref[...], jnp.sum(z, axis=1, keepdims=True),
                 preferred_element_type=jnp.float32)                           # (N*Cout, 1)
    s2 = jnp.dot(pool_ref[...], jnp.sum(z * z, axis=1, keepdims=True),
                 preferred_element_type=jnp.float32)                           # (N*Cout, 1)
    var = jnp.maximum(s2 - s1 * s1, 0.0)                                       # cancellation guard
    y = (z - s1) * (lax.rsqrt(var + BN_EPS) * gamma_ref[...]) + beta_ref[...]

    # SELU (exp on min(y, 0) so the unselected branch never produces inf).
    o_ref[...] = (SELU_SCALE *
                  jnp.where(y > 0, y,
                            SELU_ALPHA * (jnp.exp(jnp.minimum(y, 0.0)) - 1.0))
                  ).astype(o_ref.dtype)


def up_conv_bn_relu_pallas(x, conv_w, conv_b, gamma, beta, up_size):
    """x: (N, Cin, Hi, Wi) float32 -> (N, Cout, up_size, up_size)."""
    del conv_b  # per-channel constant is exactly cancelled by training-mode BN mean subtraction
    N, Cin, Hi, Wi = x.shape
    Cout = conv_w.shape[0]
    Ho = Wo = int(up_size)
    P, S = Ho * Wo, Hi * Wi
    Ppad = ((P + 127) // 128) * 128          # lane-dense output (unmasked stores)

    # ---- host-side glue: build the small linear operators ----
    A = np.kron(_bilinear_matrix(Ho, Hi), _bilinear_matrix(Wo, Wi))            # (P, S)
    At = np.zeros((S, Ppad), np.float32)
    At[:, :P] = A.T                                                            # zero-padded lanes
    # TODO(synk): for large up_size, replace the kron'ed operator with the two
    # separable per-axis operators (and tile the lane axis) to stay within VMEM.

    wc = np.asarray(conv_w, np.float32).reshape(Cout, Cin)
    # block-diagonal over batch; rows ordered (n, k) so the output reshape to NCHW
    # needs no transpose
    Wmix = np.kron(np.eye(N, dtype=np.float32), wc)                            # (N*Cout, N*Cin)
    pool = np.kron(np.ones((N, N), np.float32),
                   np.eye(Cout, dtype=np.float32)) / float(N * P)              # (N*Cout, N*Cout)

    x_flat = jnp.asarray(x, jnp.float32).reshape(N * Cin, S)
    gamma_rows = jnp.tile(jnp.asarray(gamma, jnp.float32), N).reshape(N * Cout, 1)
    beta_rows = jnp.tile(jnp.asarray(beta, jnp.float32), N).reshape(N * Cout, 1)

    # Single invocation (no grid): all operands are tiny and fully VMEM-resident.
    out_flat = pl.pallas_call(
        _kernel,
        out_shape=jax.ShapeDtypeStruct((N * Cout, Ppad), jnp.float32),
    )(x_flat, jnp.asarray(At), jnp.asarray(Wmix), jnp.asarray(pool),
      gamma_rows, beta_rows)

    # rows are ordered (n, k): reshape to NCHW is layout-free (no transpose).
    if Ppad == P:
        return out_flat.reshape(N, Cout, Ho, Wo)
    return out_flat[:, :P].reshape(N, Cout, Ho, Wo)


def _reference(x, conv_w, conv_b, gamma, beta, up_size):
    """Pure-JAX reference with identical semantics (includes the conv bias)."""
    N, Cin, Hi, Wi = x.shape
    Cout = conv_w.shape[0]
    Ho = Wo = int(up_size)
    Wh = jnp.asarray(_bilinear_matrix(Ho, Hi))
    Ww = jnp.asarray(_bilinear_matrix(Wo, Wi))
    up = jnp.einsum('ph,nchw,qw->ncpq', Wh, x.astype(jnp.float32), Ww)
    z = jnp.einsum('kc,ncpq->nkpq', conv_w.reshape(Cout, Cin), up) \
        + conv_b[None, :, None, None]
    mean = jnp.mean(z, axis=(0, 2, 3), keepdims=True)
    var = jnp.var(z, axis=(0, 2, 3), keepdims=True)     # biased, like BN training mode
    y = (z - mean) * lax.rsqrt(var + BN_EPS)
    y = y * gamma[None, :, None, None] + beta[None, :, None, None]
    return SELU_SCALE * jnp.where(y > 0, y, SELU_ALPHA * (jnp.exp(y) - 1.0))


if __name__ == "__main__":
    # Small shapes consistent with the module: NCHW input, upsample to 16x16.
    N, Cin, Hi, Wi = 2, 4, 8, 8
    Cout, up_size = 8, 16

    key = jax.random.PRNGKey(0)
    kx, kw, kb, kg, kbe = jax.random.split(key, 5)
    x = jax.random.normal(kx, (N, Cin, Hi, Wi), dtype=jnp.float32)
    conv_w = jax.random.normal(kw, (Cout, Cin, 1, 1), dtype=jnp.float32) / np.sqrt(Cin)
    conv_b = jax.random.normal(kb, (Cout,), dtype=jnp.float32) * 0.1
    gamma = 1.0 + 0.1 * jax.random.normal(kg, (Cout,), dtype=jnp.float32)
    beta = 0.1 * jax.random.normal(kbe, (Cout,), dtype=jnp.float32)

    out = up_conv_bn_relu_pallas(x, conv_w, conv_b, gamma, beta, up_size)
    out = jax.block_until_ready(out)

    ref = _reference(x, conv_w, conv_b, gamma, beta, up_size)
    assert out.shape == (N, Cout, up_size, up_size), out.shape
    err = float(np.max(np.abs(np.asarray(out) - np.asarray(ref))))
    assert np.allclose(np.asarray(out), np.asarray(ref), rtol=1e-3, atol=1e-3), err

    print("KERNEL_OK")
</pallas_src>

<mosaic_0001>
module attributes {stable_mosaic.version = 11 : i64} {
  func.func @_kernel(%arg0: memref<8x64xf32, #tpu.memory_space<vmem>>, %arg1: memref<64x256xf32, #tpu.memory_space<vmem>>, %arg2: memref<16x8xf32, #tpu.memory_space<vmem>>, %arg3: memref<16x16xf32, #tpu.memory_space<vmem>>, %arg4: memref<16x1xf32, #tpu.memory_space<vmem>>, %arg5: memref<16x1xf32, #tpu.memory_space<vmem>>, %arg6: memref<16x256xf32, #tpu.memory_space<vmem>>) attributes {dimension_semantics = [], scalar_prefetch = 0 : i64, scratch_operands = 0 : i64, tpu.core_type = #tpu.core_type<tc>} {
    %c0 = arith.constant 0 : index
    %c0_0 = arith.constant 0 : index
    %0 = vector.load %arg0[%c0, %c0_0] : memref<8x64xf32, #tpu.memory_space<vmem>>, vector<8x64xf32>
    %c0_1 = arith.constant 0 : index
    %c0_2 = arith.constant 0 : index
    %1 = vector.load %arg1[%c0_1, %c0_2] : memref<64x256xf32, #tpu.memory_space<vmem>>, vector<64x256xf32>
    %cst = arith.constant dense<0.000000e+00> : vector<8x256xf32>
    %2 = tpu.matmul %0, %1, %cst {dimension_numbers = #tpu.dot_dimension_numbers<[1], [0], [0], [1], [0, 0, 1, 1], [], []>} : vector<8x64xf32>, vector<64x256xf32>, vector<8x256xf32> -> vector<8x256xf32>
    %c0_3 = arith.constant 0 : index
    %c0_4 = arith.constant 0 : index
    %3 = vector.load %arg2[%c0_3, %c0_4] : memref<16x8xf32, #tpu.memory_space<vmem>>, vector<16x8xf32>
    %cst_5 = arith.constant dense<0.000000e+00> : vector<16x256xf32>
    %4 = tpu.matmul %3, %2, %cst_5 {dimension_numbers = #tpu.dot_dimension_numbers<[1], [0], [0], [1], [0, 0, 1, 1], [], []>} : vector<16x8xf32>, vector<8x256xf32>, vector<16x256xf32> -> vector<16x256xf32>
    %c0_6 = arith.constant 0 : index
    %c0_7 = arith.constant 0 : index
    %5 = vector.load %arg3[%c0_6, %c0_7] : memref<16x16xf32, #tpu.memory_space<vmem>>, vector<16x16xf32>
    %cst_8 = arith.constant dense<0.000000e+00> : vector<16xf32>
    %6 = vector.multi_reduction <add>, %4, %cst_8 [1] : vector<16x256xf32> to vector<16xf32>
    %7 = vector.shape_cast %6 : vector<16xf32> to vector<16x1xf32>
    %cst_9 = arith.constant dense<0.000000e+00> : vector<16x1xf32>
    %8 = tpu.matmul %5, %7, %cst_9 {dimension_numbers = #tpu.dot_dimension_numbers<[1], [0], [0], [1], [0, 0, 1, 1], [], []>} : vector<16x16xf32>, vector<16x1xf32>, vector<16x1xf32> -> vector<16x1xf32>
    %c0_10 = arith.constant 0 : index
    %c0_11 = arith.constant 0 : index
    %9 = vector.load %arg3[%c0_10, %c0_11] : memref<16x16xf32, #tpu.memory_space<vmem>>, vector<16x16xf32>
    %10 = arith.mulf %4, %4 : vector<16x256xf32>
    %cst_12 = arith.constant dense<0.000000e+00> : vector<16xf32>
    %11 = vector.multi_reduction <add>, %10, %cst_12 [1] : vector<16x256xf32> to vector<16xf32>
    %12 = vector.shape_cast %11 : vector<16xf32> to vector<16x1xf32>
    %cst_13 = arith.constant dense<0.000000e+00> : vector<16x1xf32>
    %13 = tpu.matmul %9, %12, %cst_13 {dimension_numbers = #tpu.dot_dimension_numbers<[1], [0], [0], [1], [0, 0, 1, 1], [], []>} : vector<16x16xf32>, vector<16x1xf32>, vector<16x1xf32> -> vector<16x1xf32>
    %14 = arith.mulf %8, %8 : vector<16x1xf32>
    %15 = arith.subf %13, %14 : vector<16x1xf32>
    %cst_14 = arith.constant 0.000000e+00 : f32
    %16 = vector.broadcast %cst_14 : f32 to vector<16x1xf32>
    %17 = arith.maximumf %15, %16 : vector<16x1xf32>
    %18 = vector.broadcast %8 : vector<16x1xf32> to vector<16x256xf32>
    %19 = arith.subf %4, %18 : vector<16x256xf32>
    %cst_15 = arith.constant 9.99999974E-6 : f32
    %20 = vector.broadcast %cst_15 : f32 to vector<16x1xf32>
    %21 = arith.addf %17, %20 : vector<16x1xf32>
    %22 = math.rsqrt %21 : vector<16x1xf32>
    %c0_16 = arith.constant 0 : index
    %c0_17 = arith.constant 0 : index
    %23 = vector.load %arg4[%c0_16, %c0_17] : memref<16x1xf32, #tpu.memory_space<vmem>>, vector<16x1xf32>
    %24 = arith.mulf %22, %23 : vector<16x1xf32>
    %25 = vector.broadcast %24 : vector<16x1xf32> to vector<16x256xf32>
    %26 = arith.mulf %19, %25 : vector<16x256xf32>
    %c0_18 = arith.constant 0 : index
    %c0_19 = arith.constant 0 : index
    %27 = vector.load %arg5[%c0_18, %c0_19] : memref<16x1xf32, #tpu.memory_space<vmem>>, vector<16x1xf32>
    %28 = vector.broadcast %27 : vector<16x1xf32> to vector<16x256xf32>
    %29 = arith.addf %26, %28 : vector<16x256xf32>
    %cst_20 = arith.constant 0.000000e+00 : f32
    %30 = vector.broadcast %cst_20 : f32 to vector<16x256xf32>
    %31 = arith.cmpf ogt, %29, %30 : vector<16x256xf32>
    %cst_21 = arith.constant 0.000000e+00 : f32
    %32 = vector.broadcast %cst_21 : f32 to vector<16x256xf32>
    %33 = arith.minimumf %29, %32 : vector<16x256xf32>
    %34 = math.exp %33 : vector<16x256xf32>
    %cst_22 = arith.constant 1.000000e+00 : f32
    %35 = vector.broadcast %cst_22 : f32 to vector<16x256xf32>
    %36 = arith.subf %34, %35 : vector<16x256xf32>
    %cst_23 = arith.constant 1.67326319 : f32
    %37 = vector.broadcast %cst_23 : f32 to vector<16x256xf32>
    %38 = arith.mulf %37, %36 : vector<16x256xf32>
    %39 = arith.select %31, %29, %38 : vector<16x256xi1>, vector<16x256xf32>
    %cst_24 = arith.constant 1.05070102 : f32
    %40 = vector.broadcast %cst_24 : f32 to vector<16x256xf32>
    %41 = arith.mulf %40, %39 : vector<16x256xf32>
    %c0_25 = arith.constant 0 : index
    %c0_26 = arith.constant 0 : index
    %42 = vector.load %arg6[%c0_25, %c0_26] : memref<16x256xf32, #tpu.memory_space<vmem>>, vector<16x256xf32>
    tpu.vector_store %arg6[%c0_25, %c0_26], %41 {strides = array<i32>} : memref<16x256xf32, #tpu.memory_space<vmem>>, vector<16x256xf32>,
    return
  }
}

</mosaic_0001>

<bundles_post_ra>
// kernel: tpu_custom_call.1
= control target key start
LH: loop header
LB: loop body
LE: loop exit
PB: predicated region body
PF: predicated region fallthrough
CT: control target
= control target key end

     0   :  { %11 = vsyncpa [#allocation3], 0  ;;  %s753_s0 = inlined_call_operand.vmem [shape: f32[8,64], index: 0, kind: input, shape index: {}]   ;;  %s754_s1 = inlined_call_operand.hbm [shape: f32[64,256], index: 1, kind: input, shape index: {}]   ;;  %s755_s2 = inlined_call_operand.vmem [shape: f32[16,8], index: 2, kind: input, shape index: {}]   ;;  %s756_s3 = inlined_call_operand.vmem [shape: f32[16,16], index: 3, kind: input, shape index: {}]   ;;  %s757_s4 = inlined_call_operand.vmem [shape: f32[16,1], index: 4, kind: input, shape index: {}]   ;;  %s758_s5 = inlined_call_operand.vmem [shape: f32[16,1], index: 5, kind: input, shape index: {}]   ;;  %s759_s6 = inlined_call_operand.hbm [shape: f32[16,256], index: 6, kind: output, shape index: {}]  }
   0x1   :  { %12 = vsyncpa [#allocation4], 0  ;;  %s627_s21 = smov [#allocation2]   ;;  %s579_s25 = scalar_lea.hbm %s754_s1, 2048 }
   0x2   :  { %s20_s22 = sshll.u32 %s627_s21, 4  ;;  %p580_p0 = scmp.ne.s32.totalorder %s754_s1, %s579_s25  ;;  %s21_s22 = int_to_ptr.vmem [resolvable:$true] %s20_s22 }
   0x3   :  { %p583_p1 = scmp.lt.u32.totalorder %s579_s25, %s754_s1 }
   0x5   :  { %p585_p2 = pnand %p583_p1, %p580_p0 }
   0x7   :  { %588 = shalt.err (!%p585_p2)
}
   0x8   :  { %s589_s30 = scalar_lea.vmem %s21_s22, 2048  ;;  %p594_p4 = scmp.lt.s32.totalorder %s21_s22, %s21_s22 }
   0x9   :  { %p590_p3 = scmp.ne.s32.totalorder %s21_s22, %s589_s30  ;;  %p595_p5 = scmp.lt.s32.totalorder %s589_s30, %s589_s30 }
   0xb   :  { %p596_p6 = por %p595_p5, %p594_p4 }
   0xd   :  { %p597_p7 = pnand %p596_p6, %p590_p3 }
   0xf   :  { %600 = shalt.err (!%p597_p7)
}
  0x10   :  { %s628_s7 = smov 256   ;;  %s629_s8 = smov 16  }
  0x11   :  { %26 = dma.hbm_to_vmem [thread:$0]  %s754_s1, 2048, %s21_s22, [#allocation3], %s628_s7, %s628_s7, %s629_s8  }
  0x12   :  { %623 = dma.done.wait [#allocation3], 2048  }
  0x13   :  { %624 = vsyncadd [#allocation3], 4294965248  ;;  %v630_v0 = vmov 0.0   ;;  %v40_v1 = vld [vmem:[#allocation2 + $0x8] sm:$0xff]  ;;  %v42_v2 = vld [vmem:[#allocation2 + $0x18] sm:$0xff]  ;;  %vm55_vm0 = vcmask 523264  }
  0x14   :  { %123 = vmatprep.mubr.f32.mxu0 %v630_v0  ;;  %203 = vmatprep.mubr.f32.mxu1 %v630_v0  ;;  %v39_v3 = vld [vmem:[#allocation2] sm:$0xff]  ;;  %v535_v4 = vpack.c.bf16 %v42_v2, %v40_v1  ;;  %v41_v5 = vld [vmem:[#allocation2 + $0x10] sm:$0xff]  ;;  %v44_v6 = vld [vmem:[#allocation2 + $0x28] sm:$0xff]  ;;  %vm132_vm1 = vcmask 64512   ;;  %vm224_vm2 = vcmask 130048   ;;  %v631_v43 = vmov 0  }
  0x15   :  { %v46_v7 = vld [vmem:[#allocation2 + $0x38] sm:$0xff]  ;;  %v537_v8 = vpack.c.bf16 %v41_v5, %v39_v3  ;;  %v43_v10 = vld [vmem:[#allocation2 + $0x20] sm:$0xff]  ;;  %v45_v11 = vld [vmem:[#allocation2 + $0x30] sm:$0xff]  ;;  %566 = vset.pattern.permute.xlu1 %v631_v43  ;;  %565 = vset.pattern.permute.xlu0 %v631_v43 }
  0x16   :  { %v539_v9 = vpack.c.bf16 %v46_v7, %v44_v6  ;;  %v48_v12 = vld [vmem:[#allocation2 + $0x48] sm:$0xff]  ;;  %536 = vmatprep.subr.bf16.mxu0 %v535_v4  ;;  %v50_v13 = vld [vmem:[#allocation2 + $0x58] sm:$0xff]  ;;  %v541_v14 = vpack.c.bf16 %v45_v11, %v43_v10  ;;  %v47_v16 = vld [vmem:[#allocation2 + $0x40] sm:$0xff] }
  0x17   :  { %538 = vmatpush1.bf16.msra.mxu0 %v537_v8  ;;  %v543_v15 = vpack.c.bf16 %v50_v13, %v48_v12  ;;  %v49_v17 = vld [vmem:[#allocation2 + $0x50] sm:$0xff]  ;;  %v52_v18 = vld [vmem:[#allocation2 + $0x68] sm:$0xff]  ;;  %v54_v19 = vld [vmem:[#allocation2 + $0x78] sm:$0xff] }
  0x18   :  { %540 = vmatprep.subr.bf16.mxu0 %v539_v9  ;;  %v545_v20 = vpack.c.bf16 %v49_v17, %v47_v16  ;;  %v547_v21 = vpack.c.bf16 %v54_v19, %v52_v18  ;;  %v51_v22 = vld [vmem:[#allocation2 + $0x60] sm:$0xff]  ;;  %v53_v23 = vld [vmem:[#allocation2 + $0x70] sm:$0xff]  ;;  %v131_v29 = vld [vmem:[%s755_s2 + $0x8] sm:$0xff] }
  0x19   :  { %v549_v24 = vpack.c.bf16 %v53_v23, %v51_v22  ;;  %v38_v25 = vld [vmem:[%s753_s0] sm:$0xff]  ;;  %v217_v50 = vld [vmem:[%s756_s3 + $0x8] sm:$0xff] }
  0x1a   :  { %v130_v28 = vld [vmem:[%s755_s2] sm:$0xff]  ;;  %v434_v6 = vld [vmem:[%s758_s5 + $0x8] sm:$0xff] }
  0x1b   :  { %542 = vmatpush1.bf16.msra.mxu0 %v541_v14  ;;  %v216_v42 = vld [vmem:[%s756_s3] sm:$0xff] }
  0x1c   :  { %544 = vmatprep.subr.bf16.mxu0 %v543_v15  ;;  %v433_v53 = vld [vmem:[%s758_s5] sm:$0xff] }
  0x1d   :  { %v415_v4 = vld [vmem:[%s757_s4] sm:$0xff] }
  0x1f   :  { %546 = vmatpush1.bf16.msra.mxu0 %v545_v20 }
  0x20   :  { %548 = vmatprep.subr.bf16.mxu0 %v547_v21 }
  0x23   :  { %550 = vmatpush1.bf16.msra.mxu0 %v549_v24 }
  0x26   :  { %502 = vmatmul.mubr.msk.f32.vlgmr.msra.gmra.mrb[0].mxu0 %vm55_vm0, %v38_v25 }
  0xf9   :  { %v125_v26 = vpop.f32.mrb[0].mxu0 }
  0xfa   :  { %v127_v27 = vpop.f32.mrb[1].mxu0 }
  0xfb   :  { %139 = vmatprep.subr.mxu1 %v127_v27 }
  0xfc   :  { %140 = vmatpush1.msra.mxu1 %v125_v26 }
  0xfd   :  { %503 = vmatmul.mubr.msk.f32.vlgmr.msra.gmra.mrb[0].mxu1 %vm132_vm1, %v130_v28 }
  0xfe   :  { %209 = vmatprep.mubr.f32.mxu1 %v630_v0  ;;  %v416_v0 = vld [vmem:[%s757_s4 + $0x8] sm:$0xff]  ;;  %s632_s4 = smov [#allocation5]  }
  0xff   :  { %s490_s5 = sshll.u32 %s632_s4, 4  ;;  %s491_s5 = int_to_ptr.vmem [resolvable:$true] %s490_s5 }
 0x100   :  { %s601_s25 = scalar_lea.vmem %s491_s5, 512  ;;  %p606_p9 = scmp.lt.s32.totalorder %s491_s5, %s491_s5 }
 0x101   :  { %504 = vmatmul.mubr.msk.f32.gmra.mrb[2].mxu1 %vm132_vm1, %v131_v29  ;;  %p602_p8 = scmp.ne.s32.totalorder %s491_s5, %s601_s25  ;;  %p607_p10 = scmp.lt.s32.totalorder %s601_s25, %s601_s25 }
 0x102   :  { %525 = vmatprep.mubr.msk.f32.mxu1 %vm224_vm2, %v216_v42 }
 0x103   :  { %p608_p11 = por %p607_p10, %p606_p9 }
 0x105   :  { %p609_p12 = pnand %p608_p11, %p602_p8 }
 0x1d0   :  { %v692_v30 = vpop.f32.mrb[0].mxu1 }
 0x1d1   :  { %v694_v31 = vpop.f32.mrb[1].mxu1  ;;  %v306_v32 = vmul.f32 %v692_v30, %v692_v30 }
 0x1d2   :  { %v218_v33 = vadd.f32 %v694_v31, %v692_v30  ;;  %v307_v34 = vmul.f32 %v694_v31, %v694_v31 }
 0x1d4   :  { %219 = vadd.xlane.f32.xlu0 %v218_v33  ;;  %v702_v35 = vpop.f32.mrb[2].mxu1  ;;  %v310_v36 = vadd.f32 %v307_v34, %v306_v32 }
 0x1d5   :  { %v704_v37 = vpop.f32.mrb[3].mxu1  ;;  %v308_v38 = vmul.f32 %v702_v35, %v702_v35 }
 0x1d6   :  { %311 = vadd.xlane.f32.xlu1 %v310_v36  ;;  %v221_v39 = vadd.f32 %v704_v37, %v702_v35  ;;  %v309_v40 = vmul.f32 %v704_v37, %v704_v37 }
 0x1d8   :  { %222 = vadd.xlane.f32.xlu0 %v221_v39  ;;  %v313_v41 = vadd.f32 %v309_v40, %v308_v38 }
 0x1da   :  { %314 = vadd.xlane.f32.xlu1 %v313_v41 }
 0x261   :  { %v220_v44 = vpop.xlane.xlu0 %219 }
 0x263   :  { %v312_v45 = vpop.xlane.xlu1 %311 }
 0x265   :  { %v223_v46 = vpop.xlane.xlu0 %222 }
 0x266   :  { %v551_v47 = vpack.c.bf16 %v223_v46, %v220_v44 }
 0x267   :  { %v315_v48 = vpop.xlane.xlu1 %314 }
 0x268   :  { %v555_v49 = vpack.c.bf16 %v315_v48, %v312_v45  ;;  %552 = vmatprep.subr.bf16.mxu1 %v551_v47 }
 0x269   :  { %554 = vmatpush3.bf16.msra.mxu1 %v551_v47 }
 0x26a   :  { %556 = vmatprep.subr.bf16.mxu1 %v555_v49 }
 0x26c   :  { %526 = vmatmul.mubr.msk.f32.vlgmr.msra.gmra.mrb[4].mxu1 %vm224_vm2, %v217_v50 }
 0x26d   :  { %558 = vmatpush3.bf16.msra.mxu1 %v555_v49  ;;  %532 = vmatprep.mubr.msk.f32.mxu1 %vm224_vm2, %v216_v42 }
 0x270   :  { %533 = vmatmul.mubr.msk.f32.vlgmr.msra.gmra.mrb[6].mxu1 %vm224_vm2, %v217_v50 }
 0x33f   :  { %v527_v51 = vpop.f32.mrb[4].mxu1 }
 0x340   :  { %404 = vperm.xlu1 %566, %v527_v51   ;;  %v297_v52 = vpop.f32.mrb[5].mxu1  ;;  %v392_v54 = vmul.f32 %v527_v51, %v527_v51 }
 0x341   :  { %399 = vperm.xlu0 %565, %v297_v52   ;;  %v391_v55 = vmul.f32 %v297_v52, %v297_v52 }
 0x343   :  { %v534_v56 = vpop.f32.mrb[6].mxu1 }
 0x344   :  { %v394_v57 = vsub.f32 %v534_v56, %v392_v54  ;;  %v382_v58 = vpop.f32.mrb[7].mxu1  ;;  %437 = vperm.xlu1 %566, %v433_v53  }
 0x345   :  { %v393_v59 = vsub.f32 %v382_v58, %v391_v55 }
 0x346   :  { %v396_v60 = vmax.f32 %v394_v57, 0.0 }
 0x347   :  { %v395_v61 = vmax.f32 %v393_v59, 0.0 }
 0x348   :  { %v412_v62 = vadd.f32 1e-05, %v396_v60 }
 0x349   :  { %v411_v63 = vadd.f32 1e-05, %v395_v61 }
 0x34a   :  { %567 = vrsqrt.f32 %v412_v62 }
 0x34b   :  { %569 = vrsqrt.f32 %v411_v63 }
 0x354   :  { %v568_v1 = vpop.eup %567 }
 0x355   :  { %v418_v2 = vmul.f32 %v568_v1, %v416_v0  ;;  %v570_v3 = vpop.eup %569 }
 0x356   :  { %v417_v5 = vmul.f32 %v570_v3, %v415_v4 }
 0x357   :  { %426 = vperm.xlu1 %566, %v418_v2  }
 0x35b   :  { %421 = vperm.xlu1 %566, %v417_v5  }
 0x35f   :  { %442 = vperm.xlu1 %566, %v434_v6  }
 0x3bf   :  { %v405_v7 = vpop.permute.xlu1 %404 }
 0x3c0   :  { %v400_v9 = vpop.permute.xlu0 %399  ;;  %v409_v16 = vsub.f32 %v702_v35, %v405_v7  ;;  %v410_v17 = vsub.f32 %v704_v37, %v405_v7 }
 0x3c1   :  { %v407_v11 = vsub.f32 %v692_v30, %v400_v9  ;;  %v408_v12 = vsub.f32 %v694_v31, %v400_v9 }
 0x3c3   :  { %v438_v8 = vpop.permute.xlu1 %437 }
 0x3d6   :  { %v427_v10 = vpop.permute.xlu1 %426 }
 0x3d7   :  { %v431_v20 = vmul.f32 %v427_v10, %v409_v16  ;;  %v432_v21 = vmul.f32 %v427_v10, %v410_v17 }
 0x3da   :  { %v422_v13 = vpop.permute.xlu1 %421 }
 0x3db   :  { %v429_v14 = vmul.f32 %v422_v13, %v407_v11  ;;  %v430_v15 = vmul.f32 %v422_v13, %v408_v12 }
 0x3dd   :  { %v445_v18 = vadd.f32 %v438_v8, %v429_v14  ;;  %v446_v19 = vadd.f32 %v438_v8, %v430_v15 }
 0x3de   :  { %v443_v22 = vpop.permute.xlu1 %442 }
 0x3df   :  { %v453_v23 = vmin.f32 %v445_v18, 0.0  ;;  %v454_v24 = vmin.f32 %v446_v19, 0.0  ;;  %v447_v25 = vadd.f32 %v443_v22, %v431_v20  ;;  %v448_v26 = vadd.f32 %v443_v22, %v432_v21 }
 0x3e0   :  { %vm449_vm3 = vcmp.gt.f32.partialorder %v445_v18, 0.0  ;;  %vm450_vm4 = vcmp.gt.f32.partialorder %v446_v19, 0.0 }
 0x3e1   :  { %v457_v27 = vmul.f32 1.442695, %v453_v23  ;;  %v459_v28 = vmul.f32 1.442695, %v454_v24  ;;  %v455_v29 = vmin.f32 %v447_v25, 0.0  ;;  %v456_v30 = vmin.f32 %v448_v26, 0.0 }
 0x3e2   :  { %vm451_vm5 = vcmp.gt.f32.partialorder %v447_v25, 0.0  ;;  %vm452_vm6 = vcmp.gt.f32.partialorder %v448_v26, 0.0 }
 0x3e3   :  { %571 = vpow2.f32 %v457_v27  ;;  %v461_v31 = vmul.f32 1.442695, %v455_v29  ;;  %v463_v32 = vmul.f32 1.442695, %v456_v30 }
 0x3e4   :  { %573 = vpow2.f32 %v459_v28 }
 0x3e5   :  { %575 = vpow2.f32 %v461_v31 }
 0x3e6   :  { %577 = vpow2.f32 %v463_v32 }
 0x3ed   :  { %v572_v33 = vpop.eup %571 }
 0x3ee   :  { %v574_v34 = vpop.eup %573  ;;  %v509_v35 = vadd.f32 -1.0, %v572_v33 }
 0x3ef   :  { %v510_v36 = vadd.f32 -1.0, %v574_v34  ;;  %v576_v37 = vpop.eup %575 }
 0x3f0   :  { %v469_v38 = vmul.f32 1.6732632, %v509_v35  ;;  %v578_v39 = vpop.eup %577  ;;  %v511_v41 = vadd.f32 -1.0, %v576_v37 }
 0x3f1   :  { %v470_v40 = vmul.f32 1.6732632, %v510_v36  ;;  %v512_v43 = vadd.f32 -1.0, %v578_v39 }
 0x3f2   :  { %v473_v42 = vsel %vm449_vm3, %v445_v18, %v469_v38  ;;  %v471_v46 = vmul.f32 1.6732632, %v511_v41 }
 0x3f3   :  { %v474_v44 = vsel %vm450_vm4, %v446_v19, %v470_v40  ;;  %v477_v45 = vmul.f32 1.050701, %v473_v42  ;;  %v472_v48 = vmul.f32 1.6732632, %v512_v43 }
 0x3f4   :  { %v478_v47 = vmul.f32 1.050701, %v474_v44  ;;  %v475_v49 = vsel %vm451_vm5, %v447_v25, %v471_v46 }
 0x3f5   :  { %481 = vst [vmem:[#allocation5] sm:$0xff] %v477_v45  ;;  %v476_v50 = vsel %vm452_vm6, %v448_v26, %v472_v48  ;;  %v479_v51 = vmul.f32 1.050701, %v475_v49 }
 0x3f6   :  { %482 = vst [vmem:[#allocation5 + $0x8] sm:$0xff] %v478_v47  ;;  %v480_v52 = vmul.f32 1.050701, %v476_v50 }
 0x3f7   :  { %483 = vst [vmem:[#allocation5 + $0x10] sm:$0xff] %v479_v51 }
 0x3f8   :  { %484 = vst [vmem:[#allocation5 + $0x18] sm:$0xff] %v480_v52 }
 0x3f9   :  { %612 = shalt.err (!%p609_p12)
}
 0x3fa   :  { %s613_s28 = scalar_lea.hbm %s759_s6, 512 }
 0x3fb   :  { %p614_p13 = scmp.ne.s32.totalorder %s759_s6, %s613_s28  ;;  %p617_p0 = scmp.lt.u32.totalorder %s613_s28, %s759_s6 }
 0x3fd   :  { %p619_p1 = pnand %p617_p0, %p614_p13 }
 0x3ff   :  { %622 = shalt.err (!%p619_p1)
}
 0x400   :  { %496 = dma.vmem_to_hbm [thread:$0]  %s491_s5, 512, %s759_s6, [#allocation4], %s628_s7, %s628_s7, %s629_s8  }
 0x401   :  { %625 = dma.done.wait [#allocation4], 512  }
 0x402   :  { %626 = vsyncadd [#allocation4], 4294966784 }
 0x403   :  { %500 = vsyncpa [#allocation3], 1 }
 0x404   :  { %501 = vsyncpa [#allocation4], 1 }

</bundles_post_ra>
